<compile_context>
chip_gen: v6e
topology: v6e:2x2x1
jax: 0.10.0
libtpu: 0.0.40
codegen_flags: <defaults>
</compile_context>

<pallas_src>
import functools

import jax
import jax.numpy as jnp
from jax.experimental import pallas as pl
from jax.experimental.pallas import tpu as pltpu


_VMEM_LIMIT_BYTES = 48 * 1024 * 1024   # safe on v7x (64 MiB/TC physical VMEM)
_TILE_BUDGET_BYTES = 40 * 1024 * 1024  # leave headroom for Mosaic internal scratch


def _cdiv(a, b):
    return -(-a // b)


def _round_up(v, m):
    return _cdiv(v, m) * m


def _make_kernel(alpha, x2_precomputed):
    """Build the kernel body. `alpha` is a static Python float."""
    alpha = float(alpha)
    exponent = (alpha + 1.0) / 2.0

    def _apply_power(q):
        # Trace-time specialization on the static exponent.
        if exponent == 1.0:
            return q                         # standard DEC setting (alpha = 1)
        if float(exponent).is_integer() and 1.0 < exponent <= 4.0:
            out = q
            for _ in range(int(exponent) - 1):
                out = out * q                # VPU multiply chain, no EUP log/exp
            return out
        # Generic fallback: q > 0 always, so exp/log on the EUP is safe.
        return jnp.exp(exponent * jnp.log(q))

    def _precise_recip(d):
        # EUP approximate reciprocal + one Newton-Raphson step (~f32 accuracy).
        r = pl.reciprocal(d, approx=True)
        return r * (2.0 - d * r)

    def _body(x, x2, two_mu_t, mu2, o_ref):
        # Cross term on the MXU; the factor 2 is pre-folded into two_mu_t.
        cross = jnp.dot(x, two_mu_t, preferred_element_type=jnp.float32)
        # mu2 holds ||mu_j||^2 for valid clusters and a 1e30 sentinel for padded
        # columns -> padded q ~ 1e-30, negligible in the row sum (no mask mul).
        dist2 = jnp.maximum(x2 + mu2 - cross, 0.0)

        # Student-t kernel: 1/(1 + dist2/alpha) == alpha / (alpha + dist2)
        q = _precise_recip(alpha + dist2)
        if alpha != 1.0:
            q = alpha * q
        q = _apply_power(q)

        denom = jnp.sum(q, axis=1, keepdims=True)          # (TB, 1)
        inv_denom = 1.0 / denom                             # exact divide, tiny
        o_ref[...] = (q * inv_denom).astype(o_ref.dtype)

    if x2_precomputed:
        def kernel(x_ref, x2_ref, mut_ref, mu2_ref, o_ref):
            _body(x_ref[...], x2_ref[...], mut_ref[...], mu2_ref[...], o_ref)
    else:
        def kernel(x_ref, mut_ref, mu2_ref, o_ref):
            x = x_ref[...]
            x2 = jnp.sum(x * x, axis=1, keepdims=True)      # (TB, 1) in f32
            _body(x, x2, mut_ref[...], mu2_ref[...], o_ref)

    return kernel


def _pick_batch_tile(B, D, K_pad, x_bytes, mt_bytes, use_x2):
    """Balanced, VMEM-budgeted batch tiling.

    Accounts for the double-buffered streams, the f32 elementwise temporaries
    (cross/dist2/q) and the double-buffered resident 2*mu^T so the choice is
    safe on v7x's 64 MiB VMEM while still allowing 1024+ row tiles on big
    batches (better HBM-roofline utilization on v5e/v6e).
    """
    row_align = 16 if x_bytes < 4 else 8          # bf16 packs rows in pairs
    b_rounded = _round_up(B, row_align)

    d_lane = _round_up(D, 128)                    # conservative VMEM lane padding
    per_row = (2 * d_lane * x_bytes               # x tile (2 pipeline buffers)
               + 2 * K_pad * 4                    # output tile (2 pipeline buffers)
               + 4 * K_pad * 4)                   # cross/dist2/q f32 temporaries
    if use_x2:
        per_row += 2 * 128 * 4                    # ||x||^2 column (lane padded)
    resident = 2 * d_lane * K_pad * mt_bytes + 4 * 128 * 4   # 2*mu^T + mu2
    budget = max(_TILE_BUDGET_BYTES - resident, 1 * 1024 * 1024)

    tb_max = max(row_align,
                 min(2048, (budget // per_row) // row_align * row_align))

    # Balanced tiles; force >=2 tiles when the batch allows so the "parallel"
    # grid axis can be split across v7x's two TensorCores.
    min_tiles = 2 if b_rounded >= 2 * row_align else 1
    num_tiles = max(_cdiv(b_rounded, tb_max), min_tiles)
    tb = _round_up(_cdiv(b_rounded, num_tiles), row_align)
    num_tiles = _cdiv(b_rounded, tb)
    return tb, num_tiles


@functools.partial(jax.jit, static_argnames=("alpha", "matmul_dtype"))
def clustering_layer_forward(x, mu, alpha=1.0, matmul_dtype=jnp.float32):
    """Pallas implementation of ClusteringLayer.forward.

    x:  (B, hidden_dim) float32
    mu: (n_clusters, hidden_dim) float32
    alpha: static float (t-distribution degrees of freedom)
    matmul_dtype: jnp.float32 (default, exact) or jnp.bfloat16 (MXU throughput
        mode — beneficial on v5e/v6e/v7x alike; norms stay f32).
    returns (B, n_clusters) float32
    """
    B, D = x.shape
    K, D2 = mu.shape
    assert D == D2

    matmul_dtype = jnp.dtype(matmul_dtype)
    use_bf16_stream = matmul_dtype != jnp.dtype(jnp.float32)
    x_bytes = 2 if use_bf16_stream else 4
    mt_bytes = matmul_dtype.itemsize

    # Lane-dense cluster dim.
    K_pad = max(128, _round_up(K, 128))

    TB, num_tiles = _pick_batch_tile(B, D, K_pad, x_bytes, mt_bytes,
                                     use_bf16_stream)
    B_pad = TB * num_tiles

    x_f32 = x.astype(jnp.float32)
    if B_pad != B:
        x_f32 = jnp.pad(x_f32, ((0, B_pad - B), (0, 0)))

    mu_f32 = mu.astype(jnp.float32)
    if K_pad != K:
        mu_f32 = jnp.pad(mu_f32, ((0, K_pad - K), (0, 0)))

    # ||mu_j||^2 with a large sentinel on padded cluster columns (replaces the
    # explicit 0/1 mask input and the per-tile mask multiply).
    mu2 = jnp.sum(mu_f32 * mu_f32, axis=1)
    mu2 = jnp.where(jnp.arange(K_pad) < K, mu2, jnp.float32(1e30))[None, :]

    # Fold the factor 2 of the cross term into the tiny resident matrix
    # (exact even in bf16: power-of-two scale).
    two_mu_t = (2.0 * mu_f32).T.astype(matmul_dtype)                # (D, K_pad)

    if use_bf16_stream:
        # Stream x at 2 B/elem; ||x||^2 precomputed once in f32.
        x2 = jnp.sum(x_f32 * x_f32, axis=1, keepdims=True)          # (B_pad, 1)
        x_stream = x_f32.astype(matmul_dtype)
        in_arrays = (x_stream, x2, two_mu_t, mu2)
        in_specs = [
            pl.BlockSpec((TB, D), lambda i: (i, 0)),        # x: tiled over batch
            pl.BlockSpec((TB, 1), lambda i: (i, 0)),        # ||x||^2: tiled
            pl.BlockSpec((D, K_pad), lambda i: (0, 0)),     # 2*mu^T: resident
            pl.BlockSpec((1, K_pad), lambda i: (0, 0)),     # ||mu||^2 + sentinel
        ]
    else:
        in_arrays = (x_f32, two_mu_t, mu2)
        in_specs = [
            pl.BlockSpec((TB, D), lambda i: (i, 0)),        # x: tiled over batch
            pl.BlockSpec((D, K_pad), lambda i: (0, 0)),     # 2*mu^T: resident
            pl.BlockSpec((1, K_pad), lambda i: (0, 0)),     # ||mu||^2 + sentinel
        ]

    cost = pl.CostEstimate(
        flops=2 * B_pad * K_pad * D + 10 * B_pad * K_pad,
        transcendentals=B_pad * K_pad,
        bytes_accessed=(x_bytes * B_pad * D + mt_bytes * D * K_pad
                        + 4 * B_pad * K_pad + 4 * K_pad),
    )

    out = pl.pallas_call(
        _make_kernel(float(alpha), use_bf16_stream),
        out_shape=jax.ShapeDtypeStruct((B_pad, K_pad), jnp.float32),
        grid_spec=pltpu.PrefetchScalarGridSpec(
            num_scalar_prefetch=0,
            grid=(num_tiles,),
            in_specs=in_specs,
            out_specs=pl.BlockSpec((TB, K_pad), lambda i: (i, 0)),
        ),
        compiler_params=pltpu.CompilerParams(
            dimension_semantics=("parallel",),   # independent batch tiles (v7x 2 TCs)
            vmem_limit_bytes=_VMEM_LIMIT_BYTES,
        ),
        cost_estimate=cost,
    )(*in_arrays)

    # Slice back to the module's exact output contract (B, K) float32.
    return out[:B, :K]


def _reference_forward(x, mu, alpha=1.0):
    # Pure-JAX reference mirroring the PyTorch code exactly (diff-based).
    diff = x[:, None, :] - mu[None, :, :]
    q = 1.0 / (1.0 + jnp.sum(diff * diff, axis=2) / alpha)
    q = q ** ((alpha + 1.0) / 2.0)
    return q / jnp.sum(q, axis=1, keepdims=True)


# TODO(synk): kmeans_init (sklearn KMeans) is host-side parameter init, not a kernel.

if __name__ == "__main__":
    key = jax.random.PRNGKey(0)

    # Small shapes consistent with the module: batch=8, hidden_dim=32, n_clusters=10.
    B, D, K = 8, 32, 10
    kx, kmu, kx2 = jax.random.split(key, 3)
    x = jax.random.normal(kx, (B, D), dtype=jnp.float32)
    mu = jax.random.normal(kmu, (K, D), dtype=jnp.float32)

    out = jax.block_until_ready(clustering_layer_forward(x, mu, alpha=1.0))
    ref = _reference_forward(x, mu, alpha=1.0)
    assert out.shape == (B, K)
    assert jnp.allclose(out, ref, atol=1e-5, rtol=1e-5), "mismatch vs reference"
    assert jnp.allclose(jnp.sum(out, axis=1), jnp.ones((B,)), atol=1e-5)

    # Batch not a multiple of the tile (exercises padding + the 2-tile grid)
    # and alpha != 1 (generic t-distribution exponent path).
    B2 = 37
    x2 = jax.random.normal(kx2, (B2, D), dtype=jnp.float32)
    out2 = jax.block_until_ready(clustering_layer_forward(x2, mu, alpha=2.0))
    ref2 = _reference_forward(x2, mu, alpha=2.0)
    assert out2.shape == (B2, K)
    assert jnp.allclose(out2, ref2, atol=1e-4, rtol=1e-4), "mismatch (alpha=2)"
    assert jnp.allclose(jnp.sum(out2, axis=1), jnp.ones((B2,)), atol=1e-5)

    # Optional bf16 streaming / MXU throughput mode (normalization stays exact).
    out3 = jax.block_until_ready(
        clustering_layer_forward(x2, mu, alpha=1.0, matmul_dtype=jnp.bfloat16))
    ref3 = _reference_forward(x2, mu, alpha=1.0)
    assert out3.shape == (B2, K)
    assert jnp.allclose(jnp.sum(out3, axis=1), jnp.ones((B2,)), atol=1e-3)
    assert jnp.allclose(out3, ref3, atol=5e-2, rtol=5e-2), "mismatch (bf16 mode)"

    print("KERNEL_OK")
</pallas_src>

<mosaic_0001>
module attributes {stable_mosaic.version = 11 : i64} {
  func.func @kernel(%arg0: i32, %arg1: memref<8x32xf32, #tpu.memory_space<vmem>>, %arg2: memref<32x128xf32, #tpu.memory_space<vmem>>, %arg3: memref<1x128xf32, #tpu.memory_space<vmem>>, %arg4: memref<8x128xf32, #tpu.memory_space<vmem>>) attributes {dimension_semantics = [#tpu.dimension_semantics<parallel>], iteration_bounds = array<i64: 1>, scalar_prefetch = 0 : i64, scratch_operands = 0 : i64, tpu.core_type = #tpu.core_type<tc>, window_params = [{transform_indices = @transform_0, window_bounds = array<i64: 8, 32>}, {pipeline_mode = #tpu.pipeline_mode<synchronous>, transform_indices = @transform_1, window_bounds = array<i64: 32, 128>}, {pipeline_mode = #tpu.pipeline_mode<synchronous>, transform_indices = @transform_2, window_bounds = array<i64: 1, 128>}, {transform_indices = @transform_3, window_bounds = array<i64: 8, 128>}]} {
    %c0 = arith.constant 0 : index
    %c0_0 = arith.constant 0 : index
    %0 = vector.load %arg1[%c0, %c0_0] : memref<8x32xf32, #tpu.memory_space<vmem>>, vector<8x32xf32>
    %1 = arith.mulf %0, %0 : vector<8x32xf32>
    %cst = arith.constant dense<0.000000e+00> : vector<8xf32>
    %2 = vector.multi_reduction <add>, %1, %cst [1] : vector<8x32xf32> to vector<8xf32>
    %3 = vector.shape_cast %2 : vector<8xf32> to vector<8x1xf32>
    %c0_1 = arith.constant 0 : index
    %c0_2 = arith.constant 0 : index
    %4 = vector.load %arg2[%c0_1, %c0_2] : memref<32x128xf32, #tpu.memory_space<vmem>>, vector<32x128xf32>
    %c0_3 = arith.constant 0 : index
    %c0_4 = arith.constant 0 : index
    %5 = vector.load %arg3[%c0_3, %c0_4] : memref<1x128xf32, #tpu.memory_space<vmem>>, vector<1x128xf32>
    %cst_5 = arith.constant dense<0.000000e+00> : vector<8x128xf32>
    %6 = tpu.matmul %0, %4, %cst_5 {dimension_numbers = #tpu.dot_dimension_numbers<[1], [0], [0], [1], [0, 0, 1, 1], [], []>} : vector<8x32xf32>, vector<32x128xf32>, vector<8x128xf32> -> vector<8x128xf32>
    %7 = vector.broadcast %3 : vector<8x1xf32> to vector<8x128xf32>
    %8 = vector.broadcast %5 : vector<1x128xf32> to vector<8x128xf32>
    %9 = arith.addf %7, %8 : vector<8x128xf32>
    %10 = arith.subf %9, %6 : vector<8x128xf32>
    %cst_6 = arith.constant 0.000000e+00 : f32
    %11 = vector.broadcast %cst_6 : f32 to vector<8x128xf32>
    %12 = arith.maximumf %10, %11 : vector<8x128xf32>
    %cst_7 = arith.constant 1.000000e+00 : f32
    %13 = vector.broadcast %cst_7 : f32 to vector<8x128xf32>
    %14 = arith.addf %13, %12 : vector<8x128xf32>
    %15 = tpu.reciprocal %14 {approx = true} : vector<8x128xf32> -> vector<8x128xf32>
    %16 = arith.mulf %14, %15 : vector<8x128xf32>
    %cst_8 = arith.constant 2.000000e+00 : f32
    %17 = vector.broadcast %cst_8 : f32 to vector<8x128xf32>
    %18 = arith.subf %17, %16 : vector<8x128xf32>
    %19 = arith.mulf %15, %18 : vector<8x128xf32>
    %cst_9 = arith.constant dense<0.000000e+00> : vector<8xf32>
    %20 = vector.multi_reduction <add>, %19, %cst_9 [1] : vector<8x128xf32> to vector<8xf32>
    %21 = vector.shape_cast %20 : vector<8xf32> to vector<8x1xf32>
    %cst_10 = arith.constant 1.000000e+00 : f32
    %22 = vector.broadcast %cst_10 : f32 to vector<8x1xf32>
    %23 = arith.divf %22, %21 : vector<8x1xf32>
    %24 = vector.broadcast %23 : vector<8x1xf32> to vector<8x128xf32>
    %25 = arith.mulf %19, %24 : vector<8x128xf32>
    %c0_11 = arith.constant 0 : index
    %c0_12 = arith.constant 0 : index
    %26 = vector.load %arg4[%c0_11, %c0_12] : memref<8x128xf32, #tpu.memory_space<vmem>>, vector<8x128xf32>
    tpu.vector_store %arg4[%c0_11, %c0_12], %25 {strides = array<i32>} : memref<8x128xf32, #tpu.memory_space<vmem>>, vector<8x128xf32>,
    return
  }
  func.func @transform_0(%arg0: i32) -> (i32, i32) {
    %c0_i32 = arith.constant 0 : i32
    %c0_i32_0 = arith.constant 0 : i32
    return %arg0, %c0_i32 : i32, i32
  }
  func.func @transform_1(%arg0: i32) -> (i32, i32) {
    %c0_i32 = arith.constant 0 : i32
    %c0_i32_0 = arith.constant 0 : i32
    %c0_i32_1 = arith.constant 0 : i32
    return %c0_i32, %c0_i32_0 : i32, i32
  }
  func.func @transform_2(%arg0: i32) -> (i32, i32) {
    %c0_i32 = arith.constant 0 : i32
    %c0_i32_0 = arith.constant 0 : i32
    %c0_i32_1 = arith.constant 0 : i32
    return %c0_i32, %c0_i32_0 : i32, i32
  }
  func.func @transform_3(%arg0: i32) -> (i32, i32) {
    %c0_i32 = arith.constant 0 : i32
    %c0_i32_0 = arith.constant 0 : i32
    return %arg0, %c0_i32 : i32, i32
  }
}

</mosaic_0001>

<bundles_post_ra>
// kernel: clustering_layer_forward.1
= control target key start
LH: loop header
LB: loop body
LE: loop exit
PB: predicated region body
PF: predicated region fallthrough
CT: control target
= control target key end

     0   :  { %v180_v1 = vmov 0.0   ;;  %vm181_vm0 = vmmov 0   ;;  %s224_s0 = inlined_call_operand.vmem [shape: f32[8,32], index: 0, kind: input, shape index: {}]   ;;  %s225_s1 = inlined_call_operand.vmem [shape: f32[32,128], index: 1, kind: input, shape index: {}]   ;;  %s226_s2 = inlined_call_operand.vmem [shape: f32[1,128], index: 2, kind: input, shape index: {}]   ;;  %s227_s3 = inlined_call_operand.hbm [shape: f32[8,128], index: 3, kind: output, shape index: {}]  }
   0x1   :  { %v24_v0 = vld [vmem:[%s225_s1 + $0x18] sm:$0xff]  ;;  %140 = vmatprep.subr.mxu0 %v180_v1  ;;  %v23_v2 = vld [vmem:[%s225_s1 + $0x10] sm:$0xff]  ;;  %148 = vmatprep.mubr.msk.f32.mxu0 %vm181_vm0, %v180_v1  ;;  %v15_v3 = vld [vmem:[%s224_s0] sm:$0xff] }
   0x2   :  { %141 = vmatpush3.msra.mxu0 %v24_v0  ;;  %v16_v4 = vmul.f32 %v15_v3, %v15_v3 }
   0x3   :  { %8 = vsyncpa [#allocation3], 0  ;;  %142 = vmatprep.subr.mxu0 %v180_v1  ;;  %v22_v5 = vld [vmem:[%s225_s1 + $0x8] sm:$0xff]  ;;  %vm17_vm1 = vcmask 261120   ;;  %v21_v7 = vld [vmem:[%s225_s1] sm:$0xff]  ;;  %s182_s1 = smov [#allocation2]  }
   0x4   :  { %143 = vmatpush3.msra.mxu0 %v23_v2  ;;  %v18_v6 = vsel %vm17_vm1, %v16_v4, 0.0  ;;  %v134_v8 = vld [vmem:[%s226_s2] ss:$0 sm:$0xff]  ;;  %s125_s23 = sshll.u32 %s182_s1, 4  ;;  %s126_s23 = int_to_ptr.vmem [resolvable:$true] %s125_s23 }
   0x5   :  { %144 = vmatprep.subr.mxu0 %v180_v1  ;;  %19 = vadd.xlane.f32.xlu0 %v18_v6  ;;  %s158_s2 = scalar_lea.vmem %s126_s23, 128  ;;  %p163_p1 = scmp.lt.s32.totalorder %s126_s23, %s126_s23 }
   0x6   :  { %145 = vmatpush3.msra.mxu0 %v22_v5  ;;  %p159_p0 = scmp.ne.s32.totalorder %s126_s23, %s158_s2  ;;  %p164_p2 = scmp.lt.s32.totalorder %s158_s2, %s158_s2 }
   0x7   :  { %146 = vmatprep.subr.mxu0 %v180_v1 }
   0x8   :  { %147 = vmatpush3.msra.mxu0 %v21_v7  ;;  %p165_p3 = por %p164_p2, %p163_p1 }
   0x9   :  { %149 = vmatmul.mubr.msk.f32.vlgmr.msra.gmra.mxu0 %vm17_vm1, %v15_v3 }
   0xa   :  { %p166_p4 = pnand %p165_p3, %p159_p0 }
  0x8e   :  { %v20_v9 = vpop.xlane.xlu0 %19 }
  0x8f   :  { %v105_v10 = vadd.f32 %v134_v8, %v20_v9 }
  0xc9   :  { %v95_v11 = vpop.f32.mrf.mxu0 }
  0xca   :  { %v106_v12 = vsub.f32 %v105_v10, %v95_v11 }
  0xcb   :  { %v150_v13 = vpop.f32.mrf.mxu0 }
  0xcc   :  { %v107_v14 = vmax.f32 %v106_v12, 0.0 }
  0xce   :  { %v108_v15 = vadd.f32 1.0, %v107_v14 }
  0xd0   :  { %154 = vrcp.f32 %v108_v15 }
  0xdd   :  { %v155_v16 = vpop.eup %154 }
  0xde   :  { %v110_v17 = vmul.f32 %v155_v16, %v108_v15 }
  0xe0   :  { %v111_v18 = vsub.f32 2.0, %v110_v17 }
  0xe2   :  { %v112_v19 = vmul.f32 %v155_v16, %v111_v18 }
  0xe4   :  { %113 = vadd.xlane.f32.xlu0 %v112_v19 }
 0x16d   :  { %v114_v20 = vpop.xlane.xlu0 %113 }
 0x16e   :  { %156 = vrcp.f32 %v114_v20 }
 0x17b   :  { %v157_v21 = vpop.eup %156 }
 0x17c   :  { %v117_v22 = vmul.f32 %v157_v21, %v112_v19 }
 0x17e   :  { %118 = vst [vmem:[#allocation2] sm:$0xff] %v117_v22 }
 0x17f   :  { %169 = shalt.err (!%p166_p4)
}
 0x180   :  { %128 = dma.vmem_to_hbm [thread:$0]  %s126_s23, 128, %s227_s3, [#allocation3]  }
 0x181   :  { %178 = dma.done.wait [#allocation3], 128  }
 0x182   :  { %179 = vsyncadd [#allocation3], 4294967168 }
 0x183   :  { %132 = vsyncpa [#allocation3], 1 }

</bundles_post_ra>
